<compile_context>
chip_gen: v7x
topology: tpu7x:2x2x1
jax: 0.10.0
libtpu: 0.0.40
codegen_flags: <defaults>
</compile_context>

<pallas_src>
import functools

import jax
import jax.numpy as jnp
from jax.experimental import pallas as pl
from jax.experimental.pallas import tpu as pltpu

EPS = 1e-5
GROUPS = 32
WIDTH_PER_GROUP = 8
EXPANSION = 4
LAYERS_CFG = ((64, 3, 1), (128, 4, 2), (256, 23, 2), (512, 3, 2))  # resnext101
STEM_K = 7 * 7 * 3          # 147
STEM_KPAD = 160             # padded to a 16-multiple for clean bf16 packing
HEAD_NPAD = 128             # lane-dense classifier output slab


def _round_up(x, m):
    return (x + m - 1) // m * m


# ---------------------------------------------------------------------------
# Fused dense matmul kernel:  out = relu?( A @ W + bias (+ residual) )
# A is f32 (cast to bf16 on the fly), W is bf16 with BN pre-folded.
# ---------------------------------------------------------------------------
def _mm_kernel(*refs, relu, has_residual):
    if has_residual:
        a_ref, b_ref, bias_ref, r_ref, o_ref = refs
    else:
        a_ref, b_ref, bias_ref, o_ref = refs
        r_ref = None
    y = jnp.dot(a_ref[...].astype(jnp.bfloat16), b_ref[...],
                preferred_element_type=jnp.float32)
    y = y + bias_ref[...]
    if has_residual:
        y = y + r_ref[...]
    if relu:
        y = jnp.maximum(y, 0.0)
    o_ref[...] = y


def matmul_fused(a, w, bias, residual=None, relu=False):
    """a: [M, K] f32, w: [K, N] bf16 (BN folded), bias: [1, N] f32,
    residual: optional [M, N] f32 added before the ReLU."""
    M, K = a.shape
    N = w.shape[1]
    Mp = _round_up(M, 8)                       # sublane multiple only, tm = Mp
    if Mp != M:
        a = jnp.pad(a, ((0, Mp - M), (0, 0)))
        if residual is not None:
            residual = jnp.pad(residual, ((0, Mp - M), (0, 0)))
    # N tiling: lane-dense, and >=2 parallel tiles when N is large so both
    # v7x TensorCores get work.  All N in this model are powers of two.
    tn = N if N < 256 else min(1024, N // 2)
    assert N % tn == 0 and K <= 2048
    in_specs = [pl.BlockSpec((Mp, K), lambda j: (0, 0)),
                pl.BlockSpec((K, tn), lambda j: (0, j)),
                pl.BlockSpec((1, tn), lambda j: (0, j))]
    args = [a, w, bias]
    if residual is not None:
        in_specs.append(pl.BlockSpec((Mp, tn), lambda j: (0, j)))
        args.append(residual)
    out = pl.pallas_call(
        functools.partial(_mm_kernel, relu=relu,
                          has_residual=residual is not None),
        out_shape=jax.ShapeDtypeStruct((Mp, N), jnp.float32),
        grid=(N // tn,),
        in_specs=in_specs,
        out_specs=pl.BlockSpec((Mp, tn), lambda j: (0, j)),
        compiler_params=pltpu.CompilerParams(
            dimension_semantics=("parallel",)),
    )(*args)
    return out[:M] if Mp != M else out


# ---------------------------------------------------------------------------
# Grouped 3x3 conv kernel (ResNeXt cardinality=32): per-group matmul with
# folded BN + bias + ReLU fused.  The groups are split over the grid so the
# two v7x TensorCores both get work.
# ---------------------------------------------------------------------------
def _grouped_mm_kernel(a_ref, w_ref, b_ref, o_ref, *, groups_per_step):
    for g in range(groups_per_step):
        acc = jnp.dot(a_ref[g].astype(jnp.bfloat16), w_ref[g],
                      preferred_element_type=jnp.float32)
        o_ref[g] = jnp.maximum(acc + b_ref[g], 0.0)


def grouped_conv3x3(x, w, bias, stride):
    """x: [N,H,W,C] f32, w: [G, Kg, ng] bf16 (Kg = pad(9*C/G)), bias: [G,1,ng]."""
    Nb, H, W_, C = x.shape
    G, Kg, ng = w.shape
    cg = C // G
    k, pad = 3, 1
    Ho = (H + 2 * pad - k) // stride + 1
    Wo = (W_ + 2 * pad - k) // stride + 1
    xp = jnp.pad(x, ((0, 0), (pad, pad), (pad, pad), (0, 0)))
    patches = [xp[:, di:di + Ho * stride:stride, dj:dj + Wo * stride:stride, :]
               for di in range(k) for dj in range(k)]
    col = jnp.stack(patches, axis=3)                                # [Nb,Ho,Wo,9,C]
    M = Nb * Ho * Wo
    col = col.reshape(M, k * k, G, cg).transpose(2, 0, 1, 3)        # [G,M,9,cg]
    a = col.reshape(G, M, k * k * cg)
    if Kg > k * k * cg:                                             # K padded to 16-mult
        a = jnp.pad(a, ((0, 0), (0, 0), (0, Kg - k * k * cg)))
    Mp = _round_up(M, 8)
    if Mp != M:
        a = jnp.pad(a, ((0, 0), (0, Mp - M), (0, 0)))
    gs = 2 if G % 2 == 0 else 1
    out = pl.pallas_call(
        functools.partial(_grouped_mm_kernel, groups_per_step=G // gs),
        out_shape=jax.ShapeDtypeStruct((G, Mp, ng), jnp.float32),
        grid=(gs,),
        in_specs=[pl.BlockSpec((G // gs, Mp, Kg), lambda i: (i, 0, 0)),
                  pl.BlockSpec((G // gs, Kg, ng), lambda i: (i, 0, 0)),
                  pl.BlockSpec((G // gs, 1, ng), lambda i: (i, 0, 0))],
        out_specs=pl.BlockSpec((G // gs, Mp, ng), lambda i: (i, 0, 0)),
        compiler_params=pltpu.CompilerParams(
            dimension_semantics=("parallel",)),
    )(a, w, bias)
    out = out.transpose(1, 0, 2).reshape(Mp, G * ng)[:M]
    return out.reshape(Nb, Ho, Wo, G * ng)


# ---------------------------------------------------------------------------
# Fused head: fc1 (BN1d folded) -> mish (x * tanh(softplus(x))) -> fc2.
# Output padded to a 128-lane slab (no masked partial stores).
# ---------------------------------------------------------------------------
def _head_kernel(x_ref, w1_ref, b1_ref, w2_ref, b2_ref, o_ref):
    h = jnp.dot(x_ref[...].astype(jnp.bfloat16), w1_ref[...],
                preferred_element_type=jnp.float32) + b1_ref[...]
    # softplus with PyTorch's threshold=20 behaviour
    sp = jnp.where(h > 20.0, h, jnp.log1p(jnp.exp(jnp.minimum(h, 20.0))))
    h = h * jnp.tanh(sp)                                            # mish
    o_ref[...] = (jnp.dot(h.astype(jnp.bfloat16), w2_ref[...],
                          preferred_element_type=jnp.float32) + b2_ref[...])


@functools.partial(jax.jit, static_argnames=("n_class",))
def head_fn(x, w1, b1, w2, b2, n_class):
    feats = jnp.mean(x, axis=(1, 2))           # global average pool -> [B, 2048]
    B, K1 = feats.shape
    H1 = w1.shape[1]
    Bp = _round_up(B, 8)
    if Bp != B:
        feats = jnp.pad(feats, ((0, Bp - B), (0, 0)))
    out = pl.pallas_call(
        _head_kernel,
        out_shape=jax.ShapeDtypeStruct((Bp, HEAD_NPAD), jnp.float32),
        grid=(1,),
        in_specs=[pl.BlockSpec((Bp, K1), lambda i: (0, 0)),
                  pl.BlockSpec((K1, H1), lambda i: (0, 0)),
                  pl.BlockSpec((1, H1), lambda i: (0, 0)),
                  pl.BlockSpec((H1, HEAD_NPAD), lambda i: (0, 0)),
                  pl.BlockSpec((1, HEAD_NPAD), lambda i: (0, 0))],
        out_specs=pl.BlockSpec((Bp, HEAD_NPAD), lambda i: (0, 0)),
    )(feats, w1, b1, w2, b2)
    return out[:B, :n_class]


# ---------------------------------------------------------------------------
# Stem (7x7/s2 conv + folded BN + ReLU + 3x3/s2 maxpool) and bottleneck block.
# ---------------------------------------------------------------------------
def maxpool_3x3_s2(x):
    # TODO(synk): 3x3/s2 maxpool reduction kept in plain JAX (negligible compute).
    Nb, H, W_, C = x.shape
    pad, k, s = 1, 3, 2
    Ho = (H + 2 * pad - k) // s + 1
    Wo = (W_ + 2 * pad - k) // s + 1
    xp = jnp.pad(x, ((0, 0), (pad, pad), (pad, pad), (0, 0)),
                 constant_values=-jnp.inf)
    out = None
    for di in range(k):
        for dj in range(k):
            sl = xp[:, di:di + Ho * s:s, dj:dj + Wo * s:s, :]
            out = sl if out is None else jnp.maximum(out, sl)
    return out


@jax.jit
def stem_fn(x_nchw, w, b):
    x = jnp.transpose(x_nchw, (0, 2, 3, 1)).astype(jnp.float32)     # NCHW -> NHWC
    Nb, H, W_, C = x.shape
    k, stride, pad = 7, 2, 3
    Ho = (H + 2 * pad - k) // stride + 1
    Wo = (W_ + 2 * pad - k) // stride + 1
    xp = jnp.pad(x, ((0, 0), (pad, pad), (pad, pad), (0, 0)))
    cols = [xp[:, di:di + Ho * stride:stride, dj:dj + Wo * stride:stride, :]
            for di in range(k) for dj in range(k)]
    a = jnp.concatenate(cols, axis=-1).reshape(Nb * Ho * Wo, k * k * C)
    if w.shape[0] > a.shape[1]:                                     # K padded to 160
        a = jnp.pad(a, ((0, 0), (0, w.shape[0] - a.shape[1])))
    y = matmul_fused(a, w, b, relu=True).reshape(Nb, Ho, Wo, w.shape[1])
    return maxpool_3x3_s2(y)


def _bottleneck_impl(x, blk, stride):
    Nb, H, W_, Cin = x.shape
    width = blk["w1"].shape[1]
    outc = blk["w3"].shape[1]
    # conv1 1x1 + folded BN + ReLU
    h = matmul_fused(x.reshape(-1, Cin), blk["w1"], blk["b1"], relu=True)
    h = h.reshape(Nb, H, W_, width)
    # conv2 3x3 grouped (cardinality=32), stride, + folded BN + ReLU
    h = grouped_conv3x3(h, blk["w2"], blk["b2"], stride)
    _, Ho, Wo, _ = h.shape
    # identity path (optional 1x1 strided downsample conv + folded BN, no ReLU)
    if "wd" in blk:
        xs = x[:, ::stride, ::stride, :] if stride > 1 else x
        idt = matmul_fused(xs.reshape(-1, Cin), blk["wd"], blk["bd"], relu=False)
    else:
        idt = x.reshape(-1, outc)
    # conv3 1x1 + folded BN + residual add + ReLU, fused into the matmul epilogue
    y = matmul_fused(h.reshape(-1, width), blk["w3"], blk["b3"],
                     residual=idt, relu=True)
    return y.reshape(Nb, Ho, Wo, outc)


bottleneck_fn = jax.jit(_bottleneck_impl, static_argnames=("stride",))


# ---------------------------------------------------------------------------
# Parameters (synthetic init matching resnext101_32x8d shapes, BN pre-folded,
# weights stored in bf16 in matmul layout).
# ---------------------------------------------------------------------------
def make_params(key, n_class):
    s_bn = 1.0 / (1.0 + EPS) ** 0.5       # eval BN: mean=0, var=1, gamma=1, beta=0
    counter = [0]

    def nk():
        counter[0] += 1
        return jax.random.fold_in(key, counter[0])

    def dense_w(kin, cout, std):
        w = jax.random.normal(nk(), (kin, cout), jnp.float32) * std
        return (w * s_bn).astype(jnp.bfloat16)

    p = {}
    # stem 7x7x3 -> 64 (K padded 147 -> 160 with zero rows)
    w = jax.random.normal(nk(), (STEM_K, 64), jnp.float32) * (2.0 / (49 * 64)) ** 0.5
    w = jnp.pad(w, ((0, STEM_KPAD - STEM_K), (0, 0))) * s_bn
    p["conv1_w"] = w.astype(jnp.bfloat16)
    p["conv1_b"] = jnp.zeros((1, 64), jnp.float32)

    layers = []
    in_ch = 64
    for planes, nblocks, stride in LAYERS_CFG:
        width = planes * WIDTH_PER_GROUP * GROUPS // 64      # = planes * 4
        outc = planes * EXPANSION
        cg = width // GROUPS
        kg = _round_up(9 * cg, 16)
        blocks = []
        for bi in range(nblocks):
            s = stride if bi == 0 else 1
            blk = {
                "w1": dense_w(in_ch, width, (2.0 / width) ** 0.5),
                "b1": jnp.zeros((1, width), jnp.float32),
                "w3": dense_w(width, outc, (2.0 / outc) ** 0.5),
                "b3": jnp.zeros((1, outc), jnp.float32),
            }
            wg = jax.random.normal(nk(), (GROUPS, 9 * cg, cg), jnp.float32)
            wg = wg * (2.0 / (9 * cg)) ** 0.5
            wg = jnp.pad(wg, ((0, 0), (0, kg - 9 * cg), (0, 0))) * s_bn
            blk["w2"] = wg.astype(jnp.bfloat16)
            blk["b2"] = jnp.zeros((GROUPS, 1, cg), jnp.float32)
            if s != 1 or in_ch != outc:
                blk["wd"] = dense_w(in_ch, outc, (2.0 / outc) ** 0.5)
                blk["bd"] = jnp.zeros((1, outc), jnp.float32)
            blocks.append(blk)
            in_ch = outc
        layers.append(blocks)
    p["layers"] = layers

    # head: fc1 (kaiming fan_out), BN1d folded, fc2 (xavier_uniform), padded to 128.
    num_ftrs = 512 * EXPANSION                                   # 2048
    w1 = jax.random.normal(nk(), (num_ftrs, 1024), jnp.float32) * (2.0 / 1024) ** 0.5
    b1 = jax.random.uniform(nk(), (1, 1024), jnp.float32, -1.0, 1.0) / num_ftrs ** 0.5
    p["fc1_w"] = (w1 * s_bn).astype(jnp.bfloat16)
    p["fc1_b"] = b1 * s_bn
    lim = (6.0 / (1024 + n_class)) ** 0.5
    w2 = jax.random.uniform(nk(), (1024, n_class), jnp.float32, -lim, lim)
    b2 = jax.random.uniform(nk(), (1, n_class), jnp.float32, -1.0, 1.0) / 1024 ** 0.5
    p["fc2_w"] = jnp.pad(w2, ((0, 0), (0, HEAD_NPAD - n_class))).astype(jnp.bfloat16)
    p["fc2_b"] = jnp.pad(b2, ((0, 0), (0, HEAD_NPAD - n_class)))
    return p


# ---------------------------------------------------------------------------
# Forward pass.
# ---------------------------------------------------------------------------
def clf_model_resnext_forward(params, x_nchw, n_class):
    x = stem_fn(x_nchw, params["conv1_w"], params["conv1_b"])
    for (planes, nblocks, stride), blocks in zip(LAYERS_CFG, params["layers"]):
        for bi, blk in enumerate(blocks):
            x = bottleneck_fn(x, blk, stride=stride if bi == 0 else 1)
    return head_fn(x, params["fc1_w"], params["fc1_b"],
                   params["fc2_w"], params["fc2_b"], n_class=n_class)


if __name__ == "__main__":
    key = jax.random.PRNGKey(0)
    k_params, k_x = jax.random.split(key)
    n_class = 10
    params = make_params(k_params, n_class)
    x = jax.random.normal(k_x, (2, 3, 32, 32), jnp.float32)   # NCHW, like PyTorch
    logits = clf_model_resnext_forward(params, x, n_class)
    logits = jax.block_until_ready(logits)
    assert logits.shape == (2, n_class)
    assert bool(jnp.all(jnp.isfinite(logits)))
    print("KERNEL_OK")
</pallas_src>

<mosaic_0001>
module attributes {stable_mosaic.version = 11 : i64} {
  func.func @_mm_kernel(%arg0: i32, %arg1: memref<512x160xf32, #tpu.memory_space<vmem>>, %arg2: memref<160x64xbf16, #tpu.memory_space<vmem>>, %arg3: memref<1x64xf32, #tpu.memory_space<vmem>>, %arg4: memref<512x64xf32, #tpu.memory_space<vmem>>) attributes {dimension_semantics = [#tpu.dimension_semantics<parallel>], iteration_bounds = array<i64: 1>, scalar_prefetch = 0 : i64, scratch_operands = 0 : i64, tpu.core_type = #tpu.core_type<tc>, window_params = [{pipeline_mode = #tpu.pipeline_mode<synchronous>, transform_indices = @transform_0, window_bounds = array<i64: 512, 160>}, {transform_indices = @transform_1, window_bounds = array<i64: 160, 64>}, {transform_indices = @transform_2, window_bounds = array<i64: 1, 64>}, {transform_indices = @transform_3, window_bounds = array<i64: 512, 64>}]} {
    %c0 = arith.constant 0 : index
    %c0_0 = arith.constant 0 : index
    %0 = vector.load %arg1[%c0, %c0_0] : memref<512x160xf32, #tpu.memory_space<vmem>>, vector<512x160xf32>
    %1 = arith.truncf %0 : vector<512x160xf32> to vector<512x160xbf16>
    %c0_1 = arith.constant 0 : index
    %c0_2 = arith.constant 0 : index
    %2 = vector.load %arg2[%c0_1, %c0_2] : memref<160x64xbf16, #tpu.memory_space<vmem>>, vector<160x64xbf16>
    %cst = arith.constant dense<0.000000e+00> : vector<512x64xf32>
    %3 = tpu.matmul %1, %2, %cst {dimension_numbers = #tpu.dot_dimension_numbers<[1], [0], [0], [1], [0, 0, 1, 1], [], []>} : vector<512x160xbf16>, vector<160x64xbf16>, vector<512x64xf32> -> vector<512x64xf32>
    %c0_3 = arith.constant 0 : index
    %c0_4 = arith.constant 0 : index
    %4 = vector.load %arg3[%c0_3, %c0_4] : memref<1x64xf32, #tpu.memory_space<vmem>>, vector<1x64xf32>
    %5 = vector.broadcast %4 : vector<1x64xf32> to vector<512x64xf32>
    %6 = arith.addf %3, %5 : vector<512x64xf32>
    %cst_5 = arith.constant 0.000000e+00 : f32
    %7 = vector.broadcast %cst_5 : f32 to vector<512x64xf32>
    %8 = arith.maximumf %6, %7 : vector<512x64xf32>
    %c0_6 = arith.constant 0 : index
    %c0_7 = arith.constant 0 : index
    %9 = vector.load %arg4[%c0_6, %c0_7] : memref<512x64xf32, #tpu.memory_space<vmem>>, vector<512x64xf32>
    tpu.vector_store %arg4[%c0_6, %c0_7], %8 {strides = array<i32>} : memref<512x64xf32, #tpu.memory_space<vmem>>, vector<512x64xf32>,
    return
  }
  func.func @transform_0(%arg0: i32) -> (i32, i32) {
    %c0_i32 = arith.constant 0 : i32
    %c0_i32_0 = arith.constant 0 : i32
    %c0_i32_1 = arith.constant 0 : i32
    return %c0_i32, %c0_i32_0 : i32, i32
  }
  func.func @transform_1(%arg0: i32) -> (i32, i32) {
    %c0_i32 = arith.constant 0 : i32
    %c0_i32_0 = arith.constant 0 : i32
    return %c0_i32, %arg0 : i32, i32
  }
  func.func @transform_2(%arg0: i32) -> (i32, i32) {
    %c0_i32 = arith.constant 0 : i32
    %c0_i32_0 = arith.constant 0 : i32
    return %c0_i32, %arg0 : i32, i32
  }
  func.func @transform_3(%arg0: i32) -> (i32, i32) {
    %c0_i32 = arith.constant 0 : i32
    %c0_i32_0 = arith.constant 0 : i32
    return %c0_i32, %arg0 : i32, i32
  }
}

</mosaic_0001>

<bundles_post_ra>
// kernel: stem_fn.1
= control target key start
LH: loop header
LB: loop body
LE: loop exit
PB: predicated region body
PF: predicated region fallthrough
CT: control target
= control target key end

     0   :  { %v887_v0 = vmov 0   ;;  %vm294_vm0 = vcmask 261120   ;;  %vm744_vm1 = vcmask 523264   ;;  %s1679_s1 = inlined_call_operand.vmem [shape: bf16[160,64], index: 1, kind: input, shape index: {}]   ;;  %s1680_s0 = inlined_call_operand.vmem [shape: f32[512,160], index: 0, kind: input, shape index: {}]   ;;  %s1681_s2 = inlined_call_operand.vmem [shape: f32[1,64], index: 2, kind: input, shape index: {}]   ;;  %s1682_s3 = inlined_call_operand.vmem [shape: f32[512,64], index: 3, kind: output, shape index: {}]  }
   0x1   :  { %391 = vmatprep.subr.bf16.mxu0 %v887_v0  ;;  %856 = vmatprep.subr.bf16.mxu1 %v887_v0  ;;  %v877_v1 = vld [vmem:[%s1679_s1] sm:$0xff]   ;;  %v878_v2 = vld [vmem:[%s1679_s1 + $0x8] sm:$0xff]   ;;  %v879_v3 = vld [vmem:[%s1679_s1 + $0x10] sm:$0xff]  }
   0x2   :  { %392 = vmatpush1.bf16.msra.mxu0 %v877_v1  ;;  %866 = vmatpush1.bf16.msra.mxu1 %v877_v1  ;;  %v880_v4 = vld [vmem:[%s1679_s1 + $0x18] sm:$0xff]   ;;  %v16_v5 = vld [vmem:[%s1680_s0 + $0x8] sm:$0xff]  ;;  %v881_v11 = vld [vmem:[%s1679_s1 + $0x20] sm:$0xff]  }
   0x3   :  { %393 = vmatprep.subr.bf16.mxu0 %v887_v0  ;;  %857 = vmatprep.subr.bf16.mxu1 %v887_v0  ;;  %v18_v6 = vld [vmem:[%s1680_s0 + $0x18] sm:$0xff]  ;;  %v80_v7 = vld [vmem:[%s1680_s0 + $0x208] sm:$0xff]  ;;  %v883_v13 = vld [vmem:[%s1679_s1 + $0x30] sm:$0xff]  }
   0x4   :  { %v144_v8 = vpack.c.bf16 %v18_v6, %v16_v5  ;;  %v82_v9 = vld [vmem:[%s1680_s0 + $0x218] sm:$0xff]  ;;  %v882_v12 = vld [vmem:[%s1679_s1 + $0x28] sm:$0xff]   ;;  %v885_v15 = vld [vmem:[%s1679_s1 + $0x40] sm:$0xff]  }
   0x5   :  { %v176_v10 = vpack.c.bf16 %v82_v9, %v80_v7  ;;  %v884_v14 = vld [vmem:[%s1679_s1 + $0x38] sm:$0xff]   ;;  %v886_v16 = vld [vmem:[%s1679_s1 + $0x48] sm:$0xff]   ;;  %v15_v17 = vld [vmem:[%s1680_s0] sm:$0xff] }
   0x6   :  { %394 = vmatpush1.bf16.msra.mxu0 %v878_v2  ;;  %867 = vmatpush1.bf16.msra.mxu1 %v878_v2  ;;  %v17_v18 = vld [vmem:[%s1680_s0 + $0x10] sm:$0xff]  ;;  %v79_v19 = vld [vmem:[%s1680_s0 + $0x200] sm:$0xff]  ;;  %v20_v21 = vld [vmem:[%s1680_s0 + $0x28] sm:$0xff] }
   0x7   :  { %395 = vmatprep.subr.bf16.mxu0 %v887_v0  ;;  %858 = vmatprep.subr.bf16.mxu1 %v887_v0  ;;  %v81_v20 = vld [vmem:[%s1680_s0 + $0x210] sm:$0xff]  ;;  %v22_v22 = vld [vmem:[%s1680_s0 + $0x38] sm:$0xff]  ;;  %v84_v23 = vld [vmem:[%s1680_s0 + $0x228] sm:$0xff]  ;;  %v143_v25 = vpack.c.bf16 %v17_v18, %v15_v17 }
   0x8   :  { %824 = vmatprep.mubr.msk.bf16.mxu0 %vm294_vm0, %v144_v8  ;;  %840 = vmatprep.mubr.msk.bf16.mxu1 %vm294_vm0, %v176_v10  ;;  %v86_v24 = vld [vmem:[%s1680_s0 + $0x238] sm:$0xff]  ;;  %v175_v26 = vpack.c.bf16 %v81_v20, %v79_v19  ;;  %v146_v27 = vpack.c.bf16 %v22_v22, %v20_v21  ;;  %v19_v29 = vld [vmem:[%s1680_s0 + $0x20] sm:$0xff]  ;;  %v21_v30 = vld [vmem:[%s1680_s0 + $0x30] sm:$0xff] }
   0x9   :  { %v178_v28 = vpack.c.bf16 %v86_v24, %v84_v23  ;;  %v83_v31 = vld [vmem:[%s1680_s0 + $0x220] sm:$0xff]  ;;  %v85_v32 = vld [vmem:[%s1680_s0 + $0x230] sm:$0xff]  ;;  %v24_v33 = vld [vmem:[%s1680_s0 + $0x48] sm:$0xff]  ;;  %v145_v37 = vpack.c.bf16 %v21_v30, %v19_v29 }
   0xa   :  { %396 = vmatpush1.bf16.msra.mxu0 %v879_v3  ;;  %868 = vmatpush1.bf16.msra.mxu1 %v879_v3  ;;  %v26_v34 = vld [vmem:[%s1680_s0 + $0x58] sm:$0xff]  ;;  %v88_v35 = vld [vmem:[%s1680_s0 + $0x248] sm:$0xff]  ;;  %v177_v38 = vpack.c.bf16 %v85_v32, %v83_v31  ;;  %v23_v41 = vld [vmem:[%s1680_s0 + $0x40] sm:$0xff] }
   0xb   :  { %397 = vmatprep.subr.bf16.mxu0 %v887_v0  ;;  %859 = vmatprep.subr.bf16.mxu1 %v887_v0  ;;  %v90_v36 = vld [vmem:[%s1680_s0 + $0x258] sm:$0xff]  ;;  %v148_v39 = vpack.c.bf16 %v26_v34, %v24_v33  ;;  %v25_v42 = vld [vmem:[%s1680_s0 + $0x50] sm:$0xff]  ;;  %v87_v43 = vld [vmem:[%s1680_s0 + $0x240] sm:$0xff] }
   0xc   :  { %v180_v40 = vpack.c.bf16 %v90_v36, %v88_v35  ;;  %v89_v44 = vld [vmem:[%s1680_s0 + $0x250] sm:$0xff]  ;;  %v28_v45 = vld [vmem:[%s1680_s0 + $0x68] sm:$0xff]  ;;  %v30_v46 = vld [vmem:[%s1680_s0 + $0x78] sm:$0xff]  ;;  %v147_v49 = vpack.c.bf16 %v25_v42, %v23_v41 }
   0xd   :  { %v92_v47 = vld [vmem:[%s1680_s0 + $0x268] sm:$0xff]  ;;  %v94_v48 = vld [vmem:[%s1680_s0 + $0x278] sm:$0xff]  ;;  %v179_v50 = vpack.c.bf16 %v89_v44, %v87_v43  ;;  %v150_v51 = vpack.c.bf16 %v30_v46, %v28_v45  ;;  %v27_v53 = vld [vmem:[%s1680_s0 + $0x60] sm:$0xff] }
   0xe   :  { %398 = vmatpush1.bf16.msra.mxu0 %v880_v4  ;;  %869 = vmatpush1.bf16.msra.mxu1 %v880_v4  ;;  %v182_v52 = vpack.c.bf16 %v94_v48, %v92_v47  ;;  %v29_v54 = vld [vmem:[%s1680_s0 + $0x70] sm:$0xff]  ;;  %v91_v55 = vld [vmem:[%s1680_s0 + $0x260] sm:$0xff]  ;;  %v32_v57 = vld [vmem:[%s1680_s0 + $0x88] sm:$0xff] }
   0xf   :  { %399 = vmatprep.subr.bf16.mxu0 %v887_v0  ;;  %860 = vmatprep.subr.bf16.mxu1 %v887_v0  ;;  %v93_v56 = vld [vmem:[%s1680_s0 + $0x270] sm:$0xff]  ;;  %v34_v58 = vld [vmem:[%s1680_s0 + $0x98] sm:$0xff]  ;;  %v96_v59 = vld [vmem:[%s1680_s0 + $0x288] sm:$0xff]  ;;  %v149_v61 = vpack.c.bf16 %v29_v54, %v27_v53 }
  0x10   :  { %v98_v60 = vld [vmem:[%s1680_s0 + $0x298] sm:$0xff]  ;;  %v181_v62 = vpack.c.bf16 %v93_v56, %v91_v55  ;;  %v152_v63 = vpack.c.bf16 %v34_v58, %v32_v57  ;;  %v31_v1 = vld [vmem:[%s1680_s0 + $0x80] sm:$0xff]  ;;  %v33_v2 = vld [vmem:[%s1680_s0 + $0x90] sm:$0xff] }
  0x11   :  { %v95_v3 = vld [vmem:[%s1680_s0 + $0x280] sm:$0xff]  ;;  %v97_v4 = vld [vmem:[%s1680_s0 + $0x290] sm:$0xff]  ;;  %v36_v5 = vld [vmem:[%s1680_s0 + $0xa8] sm:$0xff]  ;;  %v151_v9 = vpack.c.bf16 %v33_v2, %v31_v1 }
  0x12   :  { %400 = vmatpush1.bf16.msra.mxu0 %v881_v11  ;;  %870 = vmatpush1.bf16.msra.mxu1 %v881_v11  ;;  %v38_v6 = vld [vmem:[%s1680_s0 + $0xb8] sm:$0xff]  ;;  %v100_v7 = vld [vmem:[%s1680_s0 + $0x2a8] sm:$0xff]  ;;  %v183_v10 = vpack.c.bf16 %v97_v4, %v95_v3 }
  0x13   :  { %401 = vmatprep.subr.bf16.mxu0 %v887_v0  ;;  %861 = vmatprep.subr.bf16.mxu1 %v887_v0  ;;  %v102_v8 = vld [vmem:[%s1680_s0 + $0x2b8] sm:$0xff]  ;;  %v154_v11 = vpack.c.bf16 %v38_v6, %v36_v5  ;;  %v40_v17 = vld [vmem:[%s1680_s0 + $0xc8] sm:$0xff] }
  0x14   :  { %v42_v18 = vld [vmem:[%s1680_s0 + $0xd8] sm:$0xff]  ;;  %v104_v19 = vld [vmem:[%s1680_s0 + $0x2c8] sm:$0xff] }
  0x15   :  { %v106_v20 = vld [vmem:[%s1680_s0 + $0x2d8] sm:$0xff]  ;;  %v156_v23 = vpack.c.bf16 %v42_v18, %v40_v17  ;;  %v44_v29 = vld [vmem:[%s1680_s0 + $0xe8] sm:$0xff] }
  0x16   :  { %402 = vmatpush1.bf16.msra.mxu0 %v882_v12  ;;  %871 = vmatpush1.bf16.msra.mxu1 %v882_v12  ;;  %v186_v12 = vpack.c.bf16 %v102_v8, %v100_v7  ;;  %v188_v24 = vpack.c.bf16 %v106_v20, %v104_v19  ;;  %v46_v30 = vld [vmem:[%s1680_s0 + $0xf8] sm:$0xff]  ;;  %v108_v31 = vld [vmem:[%s1680_s0 + $0x2e8] sm:$0xff] }
  0x17   :  { %403 = vmatprep.subr.bf16.mxu0 %v887_v0  ;;  %862 = vmatprep.subr.bf16.mxu1 %v887_v0  ;;  %v110_v32 = vld [vmem:[%s1680_s0 + $0x2f8] sm:$0xff]  ;;  %v158_v35 = vpack.c.bf16 %v46_v30, %v44_v29  ;;  %v48_v41 = vld [vmem:[%s1680_s0 + $0x108] sm:$0xff] }
  0x18   :  { %v190_v36 = vpack.c.bf16 %v110_v32, %v108_v31  ;;  %v50_v42 = vld [vmem:[%s1680_s0 + $0x118] sm:$0xff]  ;;  %v112_v43 = vld [vmem:[%s1680_s0 + $0x308] sm:$0xff] }
  0x19   :  { %v114_v44 = vld [vmem:[%s1680_s0 + $0x318] sm:$0xff]  ;;  %v160_v47 = vpack.c.bf16 %v50_v42, %v48_v41  ;;  %v52_v53 = vld [vmem:[%s1680_s0 + $0x128] sm:$0xff] }
  0x1a   :  { %404 = vmatpush1.bf16.msra.mxu0 %v883_v13  ;;  %872 = vmatpush1.bf16.msra.mxu1 %v883_v13  ;;  %v35_v13 = vld [vmem:[%s1680_s0 + $0xa0] sm:$0xff]  ;;  %v192_v48 = vpack.c.bf16 %v114_v44, %v112_v43  ;;  %v54_v54 = vld [vmem:[%s1680_s0 + $0x138] sm:$0xff]  ;;  %v116_v55 = vld [vmem:[%s1680_s0 + $0x328] sm:$0xff] }
  0x1b   :  { %405 = vmatprep.subr.bf16.mxu0 %v887_v0  ;;  %863 = vmatprep.subr.bf16.mxu1 %v887_v0  ;;  %v118_v56 = vld [vmem:[%s1680_s0 + $0x338] sm:$0xff]  ;;  %v56_v1 = vld [vmem:[%s1680_s0 + $0x148] sm:$0xff] }
  0x1c   :  { %v58_v2 = vld [vmem:[%s1680_s0 + $0x158] sm:$0xff]  ;;  %v120_v3 = vld [vmem:[%s1680_s0 + $0x348] sm:$0xff] }
  0x1d   :  { %v122_v4 = vld [vmem:[%s1680_s0 + $0x358] sm:$0xff]  ;;  %v164_v7 = vpack.c.bf16 %v58_v2, %v56_v1 }
  0x1e   :  { %406 = vmatpush1.bf16.msra.mxu0 %v884_v14  ;;  %873 = vmatpush1.bf16.msra.mxu1 %v884_v14  ;;  %v37_v14 = vld [vmem:[%s1680_s0 + $0xb0] sm:$0xff]  ;;  %v196_v8 = vpack.c.bf16 %v122_v4, %v120_v3 }
  0x1f   :  { %407 = vmatprep.subr.bf16.mxu0 %v887_v0  ;;  %864 = vmatprep.subr.bf16.mxu1 %v887_v0  ;;  %v153_v21 = vpack.c.bf16 %v37_v14, %v35_v13  ;;  %v60_v13 = vld [vmem:[%s1680_s0 + $0x168] sm:$0xff]  ;;  %v62_v14 = vld [vmem:[%s1680_s0 + $0x178] sm:$0xff] }
  0x20   :  { %v166_v19 = vpack.c.bf16 %v62_v14, %v60_v13 }
  0x22   :  { %408 = vmatpush1.bf16.msra.mxu0 %v885_v15  ;;  %874 = vmatpush1.bf16.msra.mxu1 %v885_v15  ;;  %v99_v15 = vld [vmem:[%s1680_s0 + $0x2a0] sm:$0xff] }
  0x23   :  { %409 = vmatprep.subr.bf16.mxu0 %v887_v0  ;;  %865 = vmatprep.subr.bf16.mxu1 %v887_v0  ;;  %v184_v0 = vpack.c.bf16 %v98_v60, %v96_v59  ;;  %v162_v59 = vpack.c.bf16 %v54_v54, %v52_v53  ;;  %v194_v60 = vpack.c.bf16 %v118_v56, %v116_v55 }
  0x26   :  { %410 = vmatpush1.bf16.msra.mxu0 %v886_v16  ;;  %875 = vmatpush1.bf16.msra.mxu1 %v886_v16  ;;  %v101_v16 = vld [vmem:[%s1680_s0 + $0x2b0] sm:$0xff] }
  0x27   :  { %v185_v22 = vpack.c.bf16 %v101_v16, %v99_v15  ;;  %v124_v15 = vld [vmem:[%s1680_s0 + $0x368] sm:$0xff]  ;;  %v126_v16 = vld [vmem:[%s1680_s0 + $0x378] sm:$0xff] }
  0x28   :  { %v198_v20 = vpack.c.bf16 %v126_v16, %v124_v15 }
  0x29   :  { %424 = vmatmul.mubr.bf16.vlgmr.msra.gmra.mrb[0].mxu0 %v143_v25  ;;  %552 = vmatmul.mubr.bf16.vlgmr.msra.gmra.mrb[0].mxu1 %v175_v26  ;;  %v39_v25 = vld [vmem:[%s1680_s0 + $0xc0] sm:$0xff]  ;;  %v41_v26 = vld [vmem:[%s1680_s0 + $0xd0] sm:$0xff] }
  0x2a   :  { %825 = vmatprep.mubr.msk.bf16.mxu0 %vm294_vm0, %v146_v27  ;;  %841 = vmatprep.mubr.msk.bf16.mxu1 %vm294_vm0, %v178_v28  ;;  %v103_v27 = vld [vmem:[%s1680_s0 + $0x2c0] sm:$0xff]  ;;  %v105_v28 = vld [vmem:[%s1680_s0 + $0x2d0] sm:$0xff]  ;;  %v155_v33 = vpack.c.bf16 %v41_v26, %v39_v25  ;;  %v64_v25 = vld [vmem:[%s1680_s0 + $0x188] sm:$0xff] }
  0x2b   :  { %v187_v34 = vpack.c.bf16 %v105_v28, %v103_v27  ;;  %v66_v26 = vld [vmem:[%s1680_s0 + $0x198] sm:$0xff]  ;;  %v128_v27 = vld [vmem:[%s1680_s0 + $0x388] sm:$0xff] }
  0x2c   :  { %v130_v28 = vld [vmem:[%s1680_s0 + $0x398] sm:$0xff]  ;;  %v168_v31 = vpack.c.bf16 %v66_v26, %v64_v25 }
  0x2d   :  { %v200_v32 = vpack.c.bf16 %v130_v28, %v128_v27 }
  0x31   :  { %432 = vmatmul.mubr.bf16.gmra.mrb[4].mxu0 %v145_v37  ;;  %560 = vmatmul.mubr.bf16.gmra.mrb[4].mxu1 %v177_v38  ;;  %v43_v37 = vld [vmem:[%s1680_s0 + $0xe0] sm:$0xff]  ;;  %v45_v38 = vld [vmem:[%s1680_s0 + $0xf0] sm:$0xff] }
  0x32   :  { %826 = vmatprep.mubr.msk.bf16.mxu0 %vm294_vm0, %v148_v39  ;;  %842 = vmatprep.mubr.msk.bf16.mxu1 %vm294_vm0, %v180_v40  ;;  %v107_v39 = vld [vmem:[%s1680_s0 + $0x2e0] sm:$0xff]  ;;  %v109_v40 = vld [vmem:[%s1680_s0 + $0x2f0] sm:$0xff]  ;;  %v157_v45 = vpack.c.bf16 %v45_v38, %v43_v37  ;;  %v68_v37 = vld [vmem:[%s1680_s0 + $0x1a8] sm:$0xff] }
  0x33   :  { %v189_v46 = vpack.c.bf16 %v109_v40, %v107_v39  ;;  %v70_v38 = vld [vmem:[%s1680_s0 + $0x1b8] sm:$0xff]  ;;  %v132_v39 = vld [vmem:[%s1680_s0 + $0x3a8] sm:$0xff] }
  0x34   :  { %v134_v40 = vld [vmem:[%s1680_s0 + $0x3b8] sm:$0xff]  ;;  %v170_v43 = vpack.c.bf16 %v70_v38, %v68_v37 }
  0x35   :  { %v202_v44 = vpack.c.bf16 %v134_v40, %v132_v39 }
  0x39   :  { %440 = vmatmul.mubr.bf16.gmra.mrb[8].mxu0 %v147_v49  ;;  %568 = vmatmul.mubr.bf16.gmra.mrb[8].mxu1 %v179_v50  ;;  %v47_v49 = vld [vmem:[%s1680_s0 + $0x100] sm:$0xff]  ;;  %v49_v50 = vld [vmem:[%s1680_s0 + $0x110] sm:$0xff] }
  0x3a   :  { %827 = vmatprep.mubr.msk.bf16.mxu0 %vm294_vm0, %v150_v51  ;;  %843 = vmatprep.mubr.msk.bf16.mxu1 %vm294_vm0, %v182_v52  ;;  %v111_v51 = vld [vmem:[%s1680_s0 + $0x300] sm:$0xff]  ;;  %v113_v52 = vld [vmem:[%s1680_s0 + $0x310] sm:$0xff]  ;;  %v159_v57 = vpack.c.bf16 %v49_v50, %v47_v49  ;;  %v72_v49 = vld [vmem:[%s1680_s0 + $0x1c8] sm:$0xff] }
  0x3b   :  { %v191_v58 = vpack.c.bf16 %v113_v52, %v111_v51  ;;  %v74_v50 = vld [vmem:[%s1680_s0 + $0x1d8] sm:$0xff]  ;;  %v136_v51 = vld [vmem:[%s1680_s0 + $0x3c8] sm:$0xff] }
  0x3c   :  { %v138_v52 = vld [vmem:[%s1680_s0 + $0x3d8] sm:$0xff]  ;;  %v172_v55 = vpack.c.bf16 %v74_v50, %v72_v49 }
  0x3d   :  { %v204_v56 = vpack.c.bf16 %v138_v52, %v136_v51 }
  0x41   :  { %448 = vmatmul.mubr.bf16.gmra.mrb[12].mxu0 %v149_v61  ;;  %576 = vmatmul.mubr.bf16.gmra.mrb[12].mxu1 %v181_v62  ;;  %v51_v61 = vld [vmem:[%s1680_s0 + $0x120] sm:$0xff]  ;;  %v53_v62 = vld [vmem:[%s1680_s0 + $0x130] sm:$0xff] }
  0x42   :  { %828 = vmatprep.mubr.msk.bf16.mxu0 %vm294_vm0, %v152_v63  ;;  %844 = vmatprep.mubr.msk.bf16.mxu1 %vm294_vm0, %v184_v0  ;;  %v115_v63 = vld [vmem:[%s1680_s0 + $0x320] sm:$0xff]  ;;  %v117_v0 = vld [vmem:[%s1680_s0 + $0x330] sm:$0xff]  ;;  %v161_v5 = vpack.c.bf16 %v53_v62, %v51_v61  ;;  %v76_v61 = vld [vmem:[%s1680_s0 + $0x1e8] sm:$0xff] }
  0x43   :  { %v193_v6 = vpack.c.bf16 %v117_v0, %v115_v63  ;;  %v78_v62 = vld [vmem:[%s1680_s0 + $0x1f8] sm:$0xff]  ;;  %v140_v63 = vld [vmem:[%s1680_s0 + $0x3e8] sm:$0xff] }
  0x44   :  { %v142_v0 = vld [vmem:[%s1680_s0 + $0x3f8] sm:$0xff]  ;;  %v174_v3 = vpack.c.bf16 %v78_v62, %v76_v61 }
  0x45   :  { %v206_v4 = vpack.c.bf16 %v142_v0, %v140_v63 }
  0x49   :  { %456 = vmatmul.mubr.bf16.gmra.mrb[16].mxu0 %v151_v9  ;;  %584 = vmatmul.mubr.bf16.gmra.mrb[16].mxu1 %v183_v10  ;;  %v55_v9 = vld [vmem:[%s1680_s0 + $0x140] sm:$0xff]  ;;  %v57_v10 = vld [vmem:[%s1680_s0 + $0x150] sm:$0xff] }
  0x4a   :  { %829 = vmatprep.mubr.msk.bf16.mxu0 %vm294_vm0, %v154_v11  ;;  %845 = vmatprep.mubr.msk.bf16.mxu1 %vm294_vm0, %v186_v12  ;;  %v119_v11 = vld [vmem:[%s1680_s0 + $0x340] sm:$0xff]  ;;  %v121_v12 = vld [vmem:[%s1680_s0 + $0x350] sm:$0xff]  ;;  %v163_v17 = vpack.c.bf16 %v57_v10, %v55_v9 }
  0x4b   :  { %v195_v18 = vpack.c.bf16 %v121_v12, %v119_v11  ;;  %v1357_v11 = vld [vmem:[%s1681_s2] ss:$0 sm:$0xff] }
  0x51   :  { %464 = vmatmul.mubr.bf16.gmra.mrb[20].mxu0 %v153_v21  ;;  %592 = vmatmul.mubr.bf16.gmra.mrb[20].mxu1 %v185_v22  ;;  %v59_v21 = vld [vmem:[%s1680_s0 + $0x160] sm:$0xff]  ;;  %v61_v22 = vld [vmem:[%s1680_s0 + $0x170] sm:$0xff] }
  0x52   :  { %830 = vmatprep.mubr.msk.bf16.mxu0 %vm294_vm0, %v156_v23  ;;  %846 = vmatprep.mubr.msk.bf16.mxu1 %vm294_vm0, %v188_v24  ;;  %v123_v23 = vld [vmem:[%s1680_s0 + $0x360] sm:$0xff]  ;;  %v125_v24 = vld [vmem:[%s1680_s0 + $0x370] sm:$0xff]  ;;  %v165_v29 = vpack.c.bf16 %v61_v22, %v59_v21 }
  0x53   :  { %v197_v30 = vpack.c.bf16 %v125_v24, %v123_v23 }
  0x59   :  { %472 = vmatmul.mubr.bf16.gmra.mrb[24].mxu0 %v155_v33  ;;  %600 = vmatmul.mubr.bf16.gmra.mrb[24].mxu1 %v187_v34  ;;  %v63_v33 = vld [vmem:[%s1680_s0 + $0x180] sm:$0xff]  ;;  %v65_v34 = vld [vmem:[%s1680_s0 + $0x190] sm:$0xff] }
  0x5a   :  { %831 = vmatprep.mubr.msk.bf16.mxu0 %vm294_vm0, %v158_v35  ;;  %847 = vmatprep.mubr.msk.bf16.mxu1 %vm294_vm0, %v190_v36  ;;  %v127_v35 = vld [vmem:[%s1680_s0 + $0x380] sm:$0xff]  ;;  %v129_v36 = vld [vmem:[%s1680_s0 + $0x390] sm:$0xff]  ;;  %v167_v41 = vpack.c.bf16 %v65_v34, %v63_v33 }
  0x5b   :  { %v199_v42 = vpack.c.bf16 %v129_v36, %v127_v35 }
  0x61   :  { %480 = vmatmul.mubr.bf16.gmra.mrb[28].mxu0 %v157_v45  ;;  %608 = vmatmul.mubr.bf16.gmra.mrb[28].mxu1 %v189_v46  ;;  %v67_v45 = vld [vmem:[%s1680_s0 + $0x1a0] sm:$0xff]  ;;  %v69_v46 = vld [vmem:[%s1680_s0 + $0x1b0] sm:$0xff] }
  0x62   :  { %832 = vmatprep.mubr.msk.bf16.mxu0 %vm294_vm0, %v160_v47  ;;  %848 = vmatprep.mubr.msk.bf16.mxu1 %vm294_vm0, %v192_v48  ;;  %v131_v47 = vld [vmem:[%s1680_s0 + $0x3a0] sm:$0xff]  ;;  %v133_v48 = vld [vmem:[%s1680_s0 + $0x3b0] sm:$0xff]  ;;  %v169_v53 = vpack.c.bf16 %v69_v46, %v67_v45 }
  0x63   :  { %v201_v54 = vpack.c.bf16 %v133_v48, %v131_v47 }
  0x69   :  { %488 = vmatmul.mubr.bf16.gmra.mrb[32].mxu0 %v159_v57  ;;  %616 = vmatmul.mubr.bf16.gmra.mrb[32].mxu1 %v191_v58  ;;  %v71_v57 = vld [vmem:[%s1680_s0 + $0x1c0] sm:$0xff]  ;;  %v73_v58 = vld [vmem:[%s1680_s0 + $0x1d0] sm:$0xff] }
  0x6a   :  { %833 = vmatprep.mubr.msk.bf16.mxu0 %vm294_vm0, %v162_v59  ;;  %849 = vmatprep.mubr.msk.bf16.mxu1 %vm294_vm0, %v194_v60  ;;  %v135_v59 = vld [vmem:[%s1680_s0 + $0x3c0] sm:$0xff]  ;;  %v137_v60 = vld [vmem:[%s1680_s0 + $0x3d0] sm:$0xff]  ;;  %v171_v1 = vpack.c.bf16 %v73_v58, %v71_v57 }
  0x6b   :  { %v203_v2 = vpack.c.bf16 %v137_v60, %v135_v59 }
  0x71   :  { %496 = vmatmul.mubr.bf16.gmra.mrb[36].mxu0 %v161_v5  ;;  %624 = vmatmul.mubr.bf16.gmra.mrb[36].mxu1 %v193_v6  ;;  %v75_v5 = vld [vmem:[%s1680_s0 + $0x1e0] sm:$0xff]  ;;  %v77_v6 = vld [vmem:[%s1680_s0 + $0x1f0] sm:$0xff] }
  0x72   :  { %834 = vmatprep.mubr.msk.bf16.mxu0 %vm294_vm0, %v164_v7  ;;  %850 = vmatprep.mubr.msk.bf16.mxu1 %vm294_vm0, %v196_v8  ;;  %v139_v7 = vld [vmem:[%s1680_s0 + $0x3e0] sm:$0xff]  ;;  %v141_v8 = vld [vmem:[%s1680_s0 + $0x3f0] sm:$0xff]  ;;  %v173_v9 = vpack.c.bf16 %v77_v6, %v75_v5 }
  0x73   :  { %v205_v10 = vpack.c.bf16 %v141_v8, %v139_v7 }
  0x79   :  { %504 = vmatmul.mubr.bf16.gmra.mrb[40].mxu0 %v163_v17  ;;  %632 = vmatmul.mubr.bf16.gmra.mrb[40].mxu1 %v195_v18 }
  0x7a   :  { %835 = vmatprep.mubr.msk.bf16.mxu0 %vm294_vm0, %v166_v19  ;;  %851 = vmatprep.mubr.msk.bf16.mxu1 %vm294_vm0, %v198_v20 }
  0x81   :  { %512 = vmatmul.mubr.bf16.gmra.mrb[44].mxu0 %v165_v29  ;;  %640 = vmatmul.mubr.bf16.gmra.mrb[44].mxu1 %v197_v30 }
  0x82   :  { %836 = vmatprep.mubr.msk.bf16.mxu0 %vm294_vm0, %v168_v31  ;;  %852 = vmatprep.mubr.msk.bf16.mxu1 %vm294_vm0, %v200_v32 }
  0x89   :  { %520 = vmatmul.mubr.bf16.gmra.mrb[48].mxu0 %v167_v41  ;;  %648 = vmatmul.mubr.bf16.gmra.mrb[48].mxu1 %v199_v42 }
  0x8a   :  { %837 = vmatprep.mubr.msk.bf16.mxu0 %vm294_vm0, %v170_v43  ;;  %853 = vmatprep.mubr.msk.bf16.mxu1 %vm294_vm0, %v202_v44 }
  0x91   :  { %528 = vmatmul.mubr.bf16.gmra.mrb[52].mxu0 %v169_v53  ;;  %656 = vmatmul.mubr.bf16.gmra.mrb[52].mxu1 %v201_v54 }
  0x92   :  { %838 = vmatprep.mubr.msk.bf16.mxu0 %vm294_vm0, %v172_v55  ;;  %854 = vmatprep.mubr.msk.bf16.mxu1 %vm294_vm0, %v204_v56 }
  0x99   :  { %536 = vmatmul.mubr.bf16.gmra.mrb[56].mxu0 %v171_v1  ;;  %664 = vmatmul.mubr.bf16.gmra.mrb[56].mxu1 %v203_v2 }
  0x9a   :  { %839 = vmatprep.mubr.msk.bf16.mxu0 %vm294_vm0, %v174_v3  ;;  %855 = vmatprep.mubr.msk.bf16.mxu1 %vm294_vm0, %v206_v4 }
  0xa1   :  { %544 = vmatmul.mubr.bf16.gmra.mrb[60].mxu0 %v173_v9  ;;  %672 = vmatmul.mubr.bf16.gmra.mrb[60].mxu1 %v205_v10 }
  0xfc   :  { %v425_v12 = vpop.f32.mrb[0].mxu0  ;;  %v553_v13 = vpop.f32.mrb[0].mxu1 }
  0xfd   :  { %v426_v14 = vadd.f32 %v1357_v11, %v425_v12  ;;  %v554_v15 = vadd.f32 %v1357_v11, %v553_v13  ;;  %v427_v16 = vpop.f32.mrb[1].mxu0  ;;  %v555_v17 = vpop.f32.mrb[1].mxu1 }
  0xfe   :  { %v428_v18 = vpop.f32.mrb[2].mxu0  ;;  %v556_v19 = vpop.f32.mrb[2].mxu1 }
  0xff   :  { %v680_v20 = vmax.f32 %v426_v14, 0.0  ;;  %v712_v21 = vmax.f32 %v554_v15, 0.0  ;;  %v429_v22 = vadd.f32 %v1357_v11, %v428_v18  ;;  %v557_v23 = vadd.f32 %v1357_v11, %v556_v19  ;;  %v430_v24 = vpop.f32.mrb[3].mxu0  ;;  %v558_v25 = vpop.f32.mrb[3].mxu1 }
 0x101   :  { %745 = vst.msk [vmem:[%s1682_s3] sm:$0xff] %vm744_vm1, %v680_v20  ;;  %777 = vst.msk [vmem:[%s1682_s3 + $0x100] sm:$0xff] %vm744_vm1, %v712_v21  ;;  %v681_v26 = vmax.f32 %v429_v22, 0.0  ;;  %v713_v27 = vmax.f32 %v557_v23, 0.0 }
 0x103   :  { %746 = vst.msk [vmem:[%s1682_s3 + $0x8] sm:$0xff] %vm744_vm1, %v681_v26  ;;  %778 = vst.msk [vmem:[%s1682_s3 + $0x108] sm:$0xff] %vm744_vm1, %v713_v27 }
 0x104   :  { %v433_v28 = vpop.f32.mrb[4].mxu0  ;;  %v561_v29 = vpop.f32.mrb[4].mxu1 }
 0x105   :  { %v434_v30 = vadd.f32 %v1357_v11, %v433_v28  ;;  %v562_v31 = vadd.f32 %v1357_v11, %v561_v29  ;;  %v435_v32 = vpop.f32.mrb[5].mxu0  ;;  %v563_v33 = vpop.f32.mrb[5].mxu1 }
 0x106   :  { %v436_v34 = vpop.f32.mrb[6].mxu0  ;;  %v564_v35 = vpop.f32.mrb[6].mxu1 }
 0x107   :  { %v682_v36 = vmax.f32 %v434_v30, 0.0  ;;  %v714_v37 = vmax.f32 %v562_v31, 0.0  ;;  %v437_v38 = vadd.f32 %v1357_v11, %v436_v34  ;;  %v565_v39 = vadd.f32 %v1357_v11, %v564_v35  ;;  %v438_v40 = vpop.f32.mrb[7].mxu0  ;;  %v566_v41 = vpop.f32.mrb[7].mxu1 }
 0x109   :  { %747 = vst.msk [vmem:[%s1682_s3 + $0x10] sm:$0xff] %vm744_vm1, %v682_v36  ;;  %779 = vst.msk [vmem:[%s1682_s3 + $0x110] sm:$0xff] %vm744_vm1, %v714_v37  ;;  %v683_v42 = vmax.f32 %v437_v38, 0.0  ;;  %v715_v43 = vmax.f32 %v565_v39, 0.0 }
 0x10b   :  { %748 = vst.msk [vmem:[%s1682_s3 + $0x18] sm:$0xff] %vm744_vm1, %v683_v42  ;;  %780 = vst.msk [vmem:[%s1682_s3 + $0x118] sm:$0xff] %vm744_vm1, %v715_v43 }
 0x10c   :  { %v441_v44 = vpop.f32.mrb[8].mxu0  ;;  %v569_v45 = vpop.f32.mrb[8].mxu1 }
 0x10d   :  { %v442_v46 = vadd.f32 %v1357_v11, %v441_v44  ;;  %v570_v47 = vadd.f32 %v1357_v11, %v569_v45  ;;  %v443_v48 = vpop.f32.mrb[9].mxu0  ;;  %v571_v49 = vpop.f32.mrb[9].mxu1 }
 0x10e   :  { %v444_v50 = vpop.f32.mrb[10].mxu0  ;;  %v572_v51 = vpop.f32.mrb[10].mxu1 }
 0x10f   :  { %v684_v52 = vmax.f32 %v442_v46, 0.0  ;;  %v716_v53 = vmax.f32 %v570_v47, 0.0  ;;  %v445_v54 = vadd.f32 %v1357_v11, %v444_v50  ;;  %v573_v55 = vadd.f32 %v1357_v11, %v572_v51  ;;  %v446_v56 = vpop.f32.mrb[11].mxu0  ;;  %v574_v57 = vpop.f32.mrb[11].mxu1 }
 0x111   :  { %749 = vst.msk [vmem:[%s1682_s3 + $0x20] sm:$0xff] %vm744_vm1, %v684_v52  ;;  %781 = vst.msk [vmem:[%s1682_s3 + $0x120] sm:$0xff] %vm744_vm1, %v716_v53  ;;  %v685_v58 = vmax.f32 %v445_v54, 0.0  ;;  %v717_v59 = vmax.f32 %v573_v55, 0.0 }
 0x113   :  { %750 = vst.msk [vmem:[%s1682_s3 + $0x28] sm:$0xff] %vm744_vm1, %v685_v58  ;;  %782 = vst.msk [vmem:[%s1682_s3 + $0x128] sm:$0xff] %vm744_vm1, %v717_v59 }
 0x114   :  { %v449_v60 = vpop.f32.mrb[12].mxu0  ;;  %v577_v61 = vpop.f32.mrb[12].mxu1 }
 0x115   :  { %v450_v62 = vadd.f32 %v1357_v11, %v449_v60  ;;  %v578_v63 = vadd.f32 %v1357_v11, %v577_v61  ;;  %v451_v0 = vpop.f32.mrb[13].mxu0  ;;  %v579_v1 = vpop.f32.mrb[13].mxu1 }
 0x116   :  { %v452_v2 = vpop.f32.mrb[14].mxu0  ;;  %v580_v3 = vpop.f32.mrb[14].mxu1 }
 0x117   :  { %v686_v4 = vmax.f32 %v450_v62, 0.0  ;;  %v718_v5 = vmax.f32 %v578_v63, 0.0  ;;  %v453_v6 = vadd.f32 %v1357_v11, %v452_v2  ;;  %v581_v7 = vadd.f32 %v1357_v11, %v580_v3  ;;  %v454_v8 = vpop.f32.mrb[15].mxu0  ;;  %v582_v9 = vpop.f32.mrb[15].mxu1 }
 0x119   :  { %751 = vst.msk [vmem:[%s1682_s3 + $0x30] sm:$0xff] %vm744_vm1, %v686_v4  ;;  %783 = vst.msk [vmem:[%s1682_s3 + $0x130] sm:$0xff] %vm744_vm1, %v718_v5  ;;  %v687_v10 = vmax.f32 %v453_v6, 0.0  ;;  %v719_v12 = vmax.f32 %v581_v7, 0.0 }
 0x11b   :  { %752 = vst.msk [vmem:[%s1682_s3 + $0x38] sm:$0xff] %vm744_vm1, %v687_v10  ;;  %784 = vst.msk [vmem:[%s1682_s3 + $0x138] sm:$0xff] %vm744_vm1, %v719_v12 }
 0x11c   :  { %v457_v13 = vpop.f32.mrb[16].mxu0  ;;  %v585_v14 = vpop.f32.mrb[16].mxu1 }
 0x11d   :  { %v458_v15 = vadd.f32 %v1357_v11, %v457_v13  ;;  %v586_v16 = vadd.f32 %v1357_v11, %v585_v14  ;;  %v459_v17 = vpop.f32.mrb[17].mxu0  ;;  %v587_v18 = vpop.f32.mrb[17].mxu1 }
 0x11e   :  { %v460_v19 = vpop.f32.mrb[18].mxu0  ;;  %v588_v20 = vpop.f32.mrb[18].mxu1 }
 0x11f   :  { %v688_v21 = vmax.f32 %v458_v15, 0.0  ;;  %v720_v22 = vmax.f32 %v586_v16, 0.0  ;;  %v461_v23 = vadd.f32 %v1357_v11, %v460_v19  ;;  %v589_v24 = vadd.f32 %v1357_v11, %v588_v20  ;;  %v462_v25 = vpop.f32.mrb[19].mxu0  ;;  %v590_v26 = vpop.f32.mrb[19].mxu1 }
 0x121   :  { %753 = vst.msk [vmem:[%s1682_s3 + $0x40] sm:$0xff] %vm744_vm1, %v688_v21  ;;  %785 = vst.msk [vmem:[%s1682_s3 + $0x140] sm:$0xff] %vm744_vm1, %v720_v22  ;;  %v689_v27 = vmax.f32 %v461_v23, 0.0  ;;  %v721_v28 = vmax.f32 %v589_v24, 0.0 }
 0x123   :  { %754 = vst.msk [vmem:[%s1682_s3 + $0x48] sm:$0xff] %vm744_vm1, %v689_v27  ;;  %786 = vst.msk [vmem:[%s1682_s3 + $0x148] sm:$0xff] %vm744_vm1, %v721_v28 }
 0x124   :  { %v465_v29 = vpop.f32.mrb[20].mxu0  ;;  %v593_v30 = vpop.f32.mrb[20].mxu1 }
 0x125   :  { %v466_v31 = vadd.f32 %v1357_v11, %v465_v29  ;;  %v594_v32 = vadd.f32 %v1357_v11, %v593_v30  ;;  %v467_v33 = vpop.f32.mrb[21].mxu0  ;;  %v595_v34 = vpop.f32.mrb[21].mxu1 }
 0x126   :  { %v468_v35 = vpop.f32.mrb[22].mxu0  ;;  %v596_v36 = vpop.f32.mrb[22].mxu1 }
 0x127   :  { %v690_v37 = vmax.f32 %v466_v31, 0.0  ;;  %v722_v38 = vmax.f32 %v594_v32, 0.0  ;;  %v469_v39 = vadd.f32 %v1357_v11, %v468_v35  ;;  %v597_v40 = vadd.f32 %v1357_v11, %v596_v36  ;;  %v470_v41 = vpop.f32.mrb[23].mxu0  ;;  %v598_v42 = vpop.f32.mrb[23].mxu1 }
 0x129   :  { %755 = vst.msk [vmem:[%s1682_s3 + $0x50] sm:$0xff] %vm744_vm1, %v690_v37  ;;  %787 = vst.msk [vmem:[%s1682_s3 + $0x150] sm:$0xff] %vm744_vm1, %v722_v38  ;;  %v691_v43 = vmax.f32 %v469_v39, 0.0  ;;  %v723_v44 = vmax.f32 %v597_v40, 0.0 }
 0x12b   :  { %756 = vst.msk [vmem:[%s1682_s3 + $0x58] sm:$0xff] %vm744_vm1, %v691_v43  ;;  %788 = vst.msk [vmem:[%s1682_s3 + $0x158] sm:$0xff] %vm744_vm1, %v723_v44 }
 0x12c   :  { %v473_v45 = vpop.f32.mrb[24].mxu0  ;;  %v601_v46 = vpop.f32.mrb[24].mxu1 }
 0x12d   :  { %v474_v47 = vadd.f32 %v1357_v11, %v473_v45  ;;  %v602_v48 = vadd.f32 %v1357_v11, %v601_v46  ;;  %v475_v49 = vpop.f32.mrb[25].mxu0  ;;  %v603_v50 = vpop.f32.mrb[25].mxu1 }
 0x12e   :  { %v476_v51 = vpop.f32.mrb[26].mxu0  ;;  %v604_v52 = vpop.f32.mrb[26].mxu1 }
 0x12f   :  { %v692_v53 = vmax.f32 %v474_v47, 0.0  ;;  %v724_v54 = vmax.f32 %v602_v48, 0.0  ;;  %v477_v55 = vadd.f32 %v1357_v11, %v476_v51  ;;  %v605_v56 = vadd.f32 %v1357_v11, %v604_v52  ;;  %v478_v57 = vpop.f32.mrb[27].mxu0  ;;  %v606_v58 = vpop.f32.mrb[27].mxu1 }
 0x131   :  { %757 = vst.msk [vmem:[%s1682_s3 + $0x60] sm:$0xff] %vm744_vm1, %v692_v53  ;;  %789 = vst.msk [vmem:[%s1682_s3 + $0x160] sm:$0xff] %vm744_vm1, %v724_v54  ;;  %v693_v59 = vmax.f32 %v477_v55, 0.0  ;;  %v725_v60 = vmax.f32 %v605_v56, 0.0 }
 0x133   :  { %758 = vst.msk [vmem:[%s1682_s3 + $0x68] sm:$0xff] %vm744_vm1, %v693_v59  ;;  %790 = vst.msk [vmem:[%s1682_s3 + $0x168] sm:$0xff] %vm744_vm1, %v725_v60 }
 0x134   :  { %v481_v61 = vpop.f32.mrb[28].mxu0  ;;  %v609_v62 = vpop.f32.mrb[28].mxu1 }
 0x135   :  { %v482_v63 = vadd.f32 %v1357_v11, %v481_v61  ;;  %v610_v0 = vadd.f32 %v1357_v11, %v609_v62  ;;  %v483_v1 = vpop.f32.mrb[29].mxu0  ;;  %v611_v2 = vpop.f32.mrb[29].mxu1 }
 0x136   :  { %v484_v3 = vpop.f32.mrb[30].mxu0  ;;  %v612_v4 = vpop.f32.mrb[30].mxu1 }
 0x137   :  { %v694_v5 = vmax.f32 %v482_v63, 0.0  ;;  %v726_v6 = vmax.f32 %v610_v0, 0.0  ;;  %v485_v7 = vadd.f32 %v1357_v11, %v484_v3  ;;  %v613_v8 = vadd.f32 %v1357_v11, %v612_v4  ;;  %v486_v9 = vpop.f32.mrb[31].mxu0  ;;  %v614_v10 = vpop.f32.mrb[31].mxu1 }
 0x139   :  { %759 = vst.msk [vmem:[%s1682_s3 + $0x70] sm:$0xff] %vm744_vm1, %v694_v5  ;;  %791 = vst.msk [vmem:[%s1682_s3 + $0x170] sm:$0xff] %vm744_vm1, %v726_v6  ;;  %v695_v12 = vmax.f32 %v485_v7, 0.0  ;;  %v727_v13 = vmax.f32 %v613_v8, 0.0 }
 0x13b   :  { %760 = vst.msk [vmem:[%s1682_s3 + $0x78] sm:$0xff] %vm744_vm1, %v695_v12  ;;  %792 = vst.msk [vmem:[%s1682_s3 + $0x178] sm:$0xff] %vm744_vm1, %v727_v13 }
 0x13c   :  { %v489_v14 = vpop.f32.mrb[32].mxu0  ;;  %v617_v15 = vpop.f32.mrb[32].mxu1 }
 0x13d   :  { %v490_v16 = vadd.f32 %v1357_v11, %v489_v14  ;;  %v618_v17 = vadd.f32 %v1357_v11, %v617_v15  ;;  %v491_v18 = vpop.f32.mrb[33].mxu0  ;;  %v619_v19 = vpop.f32.mrb[33].mxu1 }
 0x13e   :  { %v492_v20 = vpop.f32.mrb[34].mxu0  ;;  %v620_v21 = vpop.f32.mrb[34].mxu1 }
 0x13f   :  { %v696_v22 = vmax.f32 %v490_v16, 0.0  ;;  %v728_v23 = vmax.f32 %v618_v17, 0.0  ;;  %v493_v24 = vadd.f32 %v1357_v11, %v492_v20  ;;  %v621_v25 = vadd.f32 %v1357_v11, %v620_v21  ;;  %v494_v26 = vpop.f32.mrb[35].mxu0  ;;  %v622_v27 = vpop.f32.mrb[35].mxu1 }
 0x141   :  { %761 = vst.msk [vmem:[%s1682_s3 + $0x80] sm:$0xff] %vm744_vm1, %v696_v22  ;;  %793 = vst.msk [vmem:[%s1682_s3 + $0x180] sm:$0xff] %vm744_vm1, %v728_v23  ;;  %v697_v28 = vmax.f32 %v493_v24, 0.0  ;;  %v729_v29 = vmax.f32 %v621_v25, 0.0 }
 0x143   :  { %762 = vst.msk [vmem:[%s1682_s3 + $0x88] sm:$0xff] %vm744_vm1, %v697_v28  ;;  %794 = vst.msk [vmem:[%s1682_s3 + $0x188] sm:$0xff] %vm744_vm1, %v729_v29 }
 0x144   :  { %v497_v30 = vpop.f32.mrb[36].mxu0  ;;  %v625_v31 = vpop.f32.mrb[36].mxu1 }
 0x145   :  { %v498_v32 = vadd.f32 %v1357_v11, %v497_v30  ;;  %v626_v33 = vadd.f32 %v1357_v11, %v625_v31  ;;  %v499_v34 = vpop.f32.mrb[37].mxu0  ;;  %v627_v35 = vpop.f32.mrb[37].mxu1 }
 0x146   :  { %v500_v36 = vpop.f32.mrb[38].mxu0  ;;  %v628_v37 = vpop.f32.mrb[38].mxu1 }
 0x147   :  { %v698_v38 = vmax.f32 %v498_v32, 0.0  ;;  %v730_v39 = vmax.f32 %v626_v33, 0.0  ;;  %v501_v40 = vadd.f32 %v1357_v11, %v500_v36  ;;  %v629_v41 = vadd.f32 %v1357_v11, %v628_v37  ;;  %v502_v42 = vpop.f32.mrb[39].mxu0  ;;  %v630_v43 = vpop.f32.mrb[39].mxu1 }
 0x149   :  { %763 = vst.msk [vmem:[%s1682_s3 + $0x90] sm:$0xff] %vm744_vm1, %v698_v38  ;;  %795 = vst.msk [vmem:[%s1682_s3 + $0x190] sm:$0xff] %vm744_vm1, %v730_v39  ;;  %v699_v44 = vmax.f32 %v501_v40, 0.0  ;;  %v731_v45 = vmax.f32 %v629_v41, 0.0 }
 0x14b   :  { %764 = vst.msk [vmem:[%s1682_s3 + $0x98] sm:$0xff] %vm744_vm1, %v699_v44  ;;  %796 = vst.msk [vmem:[%s1682_s3 + $0x198] sm:$0xff] %vm744_vm1, %v731_v45 }
 0x14c   :  { %v505_v46 = vpop.f32.mrb[40].mxu0  ;;  %v633_v47 = vpop.f32.mrb[40].mxu1 }
 0x14d   :  { %v506_v48 = vadd.f32 %v1357_v11, %v505_v46  ;;  %v634_v49 = vadd.f32 %v1357_v11, %v633_v47  ;;  %v507_v50 = vpop.f32.mrb[41].mxu0  ;;  %v635_v51 = vpop.f32.mrb[41].mxu1 }
 0x14e   :  { %v508_v52 = vpop.f32.mrb[42].mxu0  ;;  %v636_v53 = vpop.f32.mrb[42].mxu1 }
 0x14f   :  { %v700_v54 = vmax.f32 %v506_v48, 0.0  ;;  %v732_v55 = vmax.f32 %v634_v49, 0.0  ;;  %v509_v56 = vadd.f32 %v1357_v11, %v508_v52  ;;  %v637_v57 = vadd.f32 %v1357_v11, %v636_v53  ;;  %v510_v58 = vpop.f32.mrb[43].mxu0  ;;  %v638_v59 = vpop.f32.mrb[43].mxu1 }
 0x151   :  { %765 = vst.msk [vmem:[%s1682_s3 + $0xa0] sm:$0xff] %vm744_vm1, %v700_v54  ;;  %797 = vst.msk [vmem:[%s1682_s3 + $0x1a0] sm:$0xff] %vm744_vm1, %v732_v55  ;;  %v701_v60 = vmax.f32 %v509_v56, 0.0  ;;  %v733_v61 = vmax.f32 %v637_v57, 0.0 }
 0x153   :  { %766 = vst.msk [vmem:[%s1682_s3 + $0xa8] sm:$0xff] %vm744_vm1, %v701_v60  ;;  %798 = vst.msk [vmem:[%s1682_s3 + $0x1a8] sm:$0xff] %vm744_vm1, %v733_v61 }
 0x154   :  { %v513_v62 = vpop.f32.mrb[44].mxu0  ;;  %v641_v63 = vpop.f32.mrb[44].mxu1 }
 0x155   :  { %v514_v0 = vadd.f32 %v1357_v11, %v513_v62  ;;  %v642_v1 = vadd.f32 %v1357_v11, %v641_v63  ;;  %v515_v2 = vpop.f32.mrb[45].mxu0  ;;  %v643_v3 = vpop.f32.mrb[45].mxu1 }
 0x156   :  { %v516_v4 = vpop.f32.mrb[46].mxu0  ;;  %v644_v5 = vpop.f32.mrb[46].mxu1 }
 0x157   :  { %v702_v6 = vmax.f32 %v514_v0, 0.0  ;;  %v734_v7 = vmax.f32 %v642_v1, 0.0  ;;  %v517_v8 = vadd.f32 %v1357_v11, %v516_v4  ;;  %v645_v9 = vadd.f32 %v1357_v11, %v644_v5  ;;  %v518_v10 = vpop.f32.mrb[47].mxu0  ;;  %v646_v12 = vpop.f32.mrb[47].mxu1 }
 0x159   :  { %767 = vst.msk [vmem:[%s1682_s3 + $0xb0] sm:$0xff] %vm744_vm1, %v702_v6  ;;  %799 = vst.msk [vmem:[%s1682_s3 + $0x1b0] sm:$0xff] %vm744_vm1, %v734_v7  ;;  %v703_v13 = vmax.f32 %v517_v8, 0.0  ;;  %v735_v14 = vmax.f32 %v645_v9, 0.0 }
 0x15b   :  { %768 = vst.msk [vmem:[%s1682_s3 + $0xb8] sm:$0xff] %vm744_vm1, %v703_v13  ;;  %800 = vst.msk [vmem:[%s1682_s3 + $0x1b8] sm:$0xff] %vm744_vm1, %v735_v14 }
 0x15c   :  { %v521_v15 = vpop.f32.mrb[48].mxu0  ;;  %v649_v16 = vpop.f32.mrb[48].mxu1 }
 0x15d   :  { %v522_v17 = vadd.f32 %v1357_v11, %v521_v15  ;;  %v650_v18 = vadd.f32 %v1357_v11, %v649_v16  ;;  %v523_v19 = vpop.f32.mrb[49].mxu0  ;;  %v651_v20 = vpop.f32.mrb[49].mxu1 }
 0x15e   :  { %v524_v21 = vpop.f32.mrb[50].mxu0  ;;  %v652_v22 = vpop.f32.mrb[50].mxu1 }
 0x15f   :  { %v704_v23 = vmax.f32 %v522_v17, 0.0  ;;  %v736_v24 = vmax.f32 %v650_v18, 0.0  ;;  %v525_v25 = vadd.f32 %v1357_v11, %v524_v21  ;;  %v653_v26 = vadd.f32 %v1357_v11, %v652_v22  ;;  %v526_v27 = vpop.f32.mrb[51].mxu0  ;;  %v654_v28 = vpop.f32.mrb[51].mxu1 }
 0x161   :  { %769 = vst.msk [vmem:[%s1682_s3 + $0xc0] sm:$0xff] %vm744_vm1, %v704_v23  ;;  %801 = vst.msk [vmem:[%s1682_s3 + $0x1c0] sm:$0xff] %vm744_vm1, %v736_v24  ;;  %v705_v29 = vmax.f32 %v525_v25, 0.0  ;;  %v737_v30 = vmax.f32 %v653_v26, 0.0 }
 0x163   :  { %770 = vst.msk [vmem:[%s1682_s3 + $0xc8] sm:$0xff] %vm744_vm1, %v705_v29  ;;  %802 = vst.msk [vmem:[%s1682_s3 + $0x1c8] sm:$0xff] %vm744_vm1, %v737_v30 }
 0x164   :  { %v529_v31 = vpop.f32.mrb[52].mxu0  ;;  %v657_v32 = vpop.f32.mrb[52].mxu1 }
 0x165   :  { %v530_v33 = vadd.f32 %v1357_v11, %v529_v31  ;;  %v658_v34 = vadd.f32 %v1357_v11, %v657_v32  ;;  %v531_v35 = vpop.f32.mrb[53].mxu0  ;;  %v659_v36 = vpop.f32.mrb[53].mxu1 }
 0x166   :  { %v532_v37 = vpop.f32.mrb[54].mxu0  ;;  %v660_v38 = vpop.f32.mrb[54].mxu1 }
 0x167   :  { %v706_v39 = vmax.f32 %v530_v33, 0.0  ;;  %v738_v40 = vmax.f32 %v658_v34, 0.0  ;;  %v533_v41 = vadd.f32 %v1357_v11, %v532_v37  ;;  %v661_v42 = vadd.f32 %v1357_v11, %v660_v38  ;;  %v534_v43 = vpop.f32.mrb[55].mxu0  ;;  %v662_v44 = vpop.f32.mrb[55].mxu1 }
 0x169   :  { %771 = vst.msk [vmem:[%s1682_s3 + $0xd0] sm:$0xff] %vm744_vm1, %v706_v39  ;;  %803 = vst.msk [vmem:[%s1682_s3 + $0x1d0] sm:$0xff] %vm744_vm1, %v738_v40  ;;  %v707_v45 = vmax.f32 %v533_v41, 0.0  ;;  %v739_v46 = vmax.f32 %v661_v42, 0.0 }
 0x16b   :  { %772 = vst.msk [vmem:[%s1682_s3 + $0xd8] sm:$0xff] %vm744_vm1, %v707_v45  ;;  %804 = vst.msk [vmem:[%s1682_s3 + $0x1d8] sm:$0xff] %vm744_vm1, %v739_v46 }
 0x16c   :  { %v537_v47 = vpop.f32.mrb[56].mxu0  ;;  %v665_v48 = vpop.f32.mrb[56].mxu1 }
 0x16d   :  { %v538_v49 = vadd.f32 %v1357_v11, %v537_v47  ;;  %v666_v50 = vadd.f32 %v1357_v11, %v665_v48  ;;  %v539_v51 = vpop.f32.mrb[57].mxu0  ;;  %v667_v52 = vpop.f32.mrb[57].mxu1 }
 0x16e   :  { %v540_v53 = vpop.f32.mrb[58].mxu0  ;;  %v668_v54 = vpop.f32.mrb[58].mxu1 }
 0x16f   :  { %v708_v55 = vmax.f32 %v538_v49, 0.0  ;;  %v740_v56 = vmax.f32 %v666_v50, 0.0  ;;  %v541_v57 = vadd.f32 %v1357_v11, %v540_v53  ;;  %v669_v58 = vadd.f32 %v1357_v11, %v668_v54  ;;  %v542_v59 = vpop.f32.mrb[59].mxu0  ;;  %v670_v60 = vpop.f32.mrb[59].mxu1 }
 0x171   :  { %773 = vst.msk [vmem:[%s1682_s3 + $0xe0] sm:$0xff] %vm744_vm1, %v708_v55  ;;  %805 = vst.msk [vmem:[%s1682_s3 + $0x1e0] sm:$0xff] %vm744_vm1, %v740_v56  ;;  %v709_v61 = vmax.f32 %v541_v57, 0.0  ;;  %v741_v62 = vmax.f32 %v669_v58, 0.0 }
 0x173   :  { %774 = vst.msk [vmem:[%s1682_s3 + $0xe8] sm:$0xff] %vm744_vm1, %v709_v61  ;;  %806 = vst.msk [vmem:[%s1682_s3 + $0x1e8] sm:$0xff] %vm744_vm1, %v741_v62 }
 0x174   :  { %v545_v63 = vpop.f32.mrb[60].mxu0  ;;  %v673_v0 = vpop.f32.mrb[60].mxu1 }
 0x175   :  { %v546_v1 = vadd.f32 %v1357_v11, %v545_v63  ;;  %v674_v2 = vadd.f32 %v1357_v11, %v673_v0  ;;  %v547_v3 = vpop.f32.mrb[61].mxu0  ;;  %v675_v4 = vpop.f32.mrb[61].mxu1 }
 0x176   :  { %v548_v5 = vpop.f32.mrb[62].mxu0  ;;  %v676_v6 = vpop.f32.mrb[62].mxu1 }
 0x177   :  { %v710_v7 = vmax.f32 %v546_v1, 0.0  ;;  %v742_v8 = vmax.f32 %v674_v2, 0.0  ;;  %v549_v9 = vadd.f32 %v1357_v11, %v548_v5  ;;  %v677_v10 = vadd.f32 %v1357_v11, %v676_v6  ;;  %v550_v12 = vpop.f32.mrb[63].mxu0  ;;  %v678_v13 = vpop.f32.mrb[63].mxu1 }
 0x179   :  { %775 = vst.msk [vmem:[%s1682_s3 + $0xf0] sm:$0xff] %vm744_vm1, %v710_v7  ;;  %807 = vst.msk [vmem:[%s1682_s3 + $0x1f0] sm:$0xff] %vm744_vm1, %v742_v8  ;;  %v711_v14 = vmax.f32 %v549_v9, 0.0  ;;  %v743_v15 = vmax.f32 %v677_v10, 0.0 }
 0x17b   :  { %776 = vst.msk [vmem:[%s1682_s3 + $0xf8] sm:$0xff] %vm744_vm1, %v711_v14  ;;  %808 = vst.msk [vmem:[%s1682_s3 + $0x1f8] sm:$0xff] %vm744_vm1, %v743_v15 }

</bundles_post_ra>
